<compile_context>
chip_gen: v5e
topology: v5e:2x2
jax: 0.10.0
libtpu: 0.0.40
codegen_flags: <defaults>
</compile_context>

<pallas_src>
import functools

import jax
import jax.numpy as jnp
import numpy as np
from jax.experimental import pallas as pl
from jax.experimental.pallas import tpu as pltpu

ALPHA = 0.2            # LeakyReLU negative slope
NEG_INF = -9e15        # same sentinel as the torch code
LANE = 128


def _round_up(x, m):
    return ((x + m - 1) // m) * m


def _pick_tile(size, candidates):
    for c in candidates:
        if c <= size and size % c == 0:
            return c
    return size


def _pick_tm(n_pad, candidates):
    tm = _pick_tile(n_pad, candidates)
    # Guarantee >= 2 blocks on the "parallel" row axis so both v7x TensorCores
    # (and megacore sharding generally) get work even for small graphs.
    while n_pad // tm < 2 and tm % 16 == 0:
        tm //= 2
    return tm


def _vmem_budget_bytes():
    cap = 64 * 1024 * 1024                      # conservative default (v7x-sized)
    try:
        cap = int(pltpu.get_tpu_info().vmem_capacity_bytes)
    except Exception:
        pass
    if cap >= 128 * 1024 * 1024:                # v5e / v6e: 128 MiB physical
        return 96 * 1024 * 1024
    return 40 * 1024 * 1024                     # v7x: 64 MiB physical


# ---------------------------------------------------------------------------
# Kernel 1: projection matmul  ->  h_attn (compute_dtype), f1, f2 (f32)
# ---------------------------------------------------------------------------
def _projection_kernel(x_ref, w_ref, h_ref, f1_ref, f2_ref, acc_ref, *,
                       f_out, ones_col):
    k = pl.program_id(1)

    @pl.when(k == 0)
    def _():
        acc_ref[...] = jnp.zeros_like(acc_ref)

    acc_ref[...] += jnp.dot(x_ref[...], w_ref[...],
                            preferred_element_type=jnp.float32)

    @pl.when(k == pl.num_programs(1) - 1)
    def _():
        acc = acc_ref[...]
        # Attention-logit halves stay f32 (tiny: one column each).
        f1_ref[...] = acc[:, f_out:f_out + 1]
        f2_ref[...] = acc[:, f_out + 1:f_out + 2]
        # Stamp a constant 1.0 column: kernel 2 folds the softmax denominator
        # into its p @ h MXU matmul through this column.
        col = jax.lax.broadcasted_iota(jnp.int32, acc.shape, 1)
        h_ref[...] = jnp.where(col == ones_col, 1.0, acc).astype(h_ref.dtype)


def _projection(x_pad, w_pad, *, tm, tk, f_aug, f_out, ones_col, compute_dtype,
                vmem_limit):
    n_pad, f_in_pad = x_pad.shape
    kernel = functools.partial(_projection_kernel, f_out=f_out, ones_col=ones_col)
    return pl.pallas_call(
        kernel,
        out_shape=(
            jax.ShapeDtypeStruct((n_pad, f_aug), compute_dtype),   # h_attn
            jax.ShapeDtypeStruct((n_pad, 1), jnp.float32),          # f1
            jax.ShapeDtypeStruct((n_pad, 1), jnp.float32),          # f2
        ),
        grid_spec=pltpu.PrefetchScalarGridSpec(
            num_scalar_prefetch=0,
            grid=(n_pad // tm, f_in_pad // tk),
            in_specs=[
                pl.BlockSpec((tm, tk), lambda i, k: (i, k)),
                pl.BlockSpec((tk, f_aug), lambda i, k: (k, 0)),
            ],
            out_specs=[
                pl.BlockSpec((tm, f_aug), lambda i, k: (i, 0)),
                pl.BlockSpec((tm, 1), lambda i, k: (i, 0)),
                pl.BlockSpec((tm, 1), lambda i, k: (i, 0)),
            ],
            scratch_shapes=[pltpu.VMEM((tm, f_aug), jnp.float32)],
        ),
        compiler_params=pltpu.CompilerParams(
            dimension_semantics=("parallel", "arbitrary"),
            vmem_limit_bytes=vmem_limit,
        ),
    )(x_pad, w_pad)


# ---------------------------------------------------------------------------
# Kernel 2: masked online-softmax attention + aggregation
# ---------------------------------------------------------------------------
def _attention_kernel(f1_ref, f2_ref, adj_ref, h_ref, o_ref, m_sc, acc_sc, *,
                      apply_elu, ones_col, tn, h_resident, refine_recip):
    j = pl.program_id(1)

    @pl.when(j == 0)
    def _():
        m_sc[...] = jnp.full_like(m_sc, -jnp.inf)
        acc_sc[...] = jnp.zeros_like(acc_sc)

    # e[i, j] = LeakyReLU(f1[i] + f2[j]) masked by adjacency.  Short VPU chain:
    # maximum-based LeakyReLU, direct int8 compare (no f32 cast of the mask).
    e = f1_ref[...] + f2_ref[...]                  # (Tm,1)+(1,Tn) -> (Tm,Tn) f32
    e = jnp.maximum(e, ALPHA * e)
    e = jnp.where(adj_ref[...] != 0, e, NEG_INF)
    # NOTE: rows with no edge at all (and padded rows) softmax the sentinel into a
    # near-uniform distribution (same degenerate behavior as the torch original).

    # Online (flash-style) softmax update.  The denominator rides the MXU matmul
    # through the ones column of h: no cross-lane row-sum, no l-scratch.
    m_prev = m_sc[...]
    m_new = jnp.maximum(m_prev, jnp.max(e, axis=1, keepdims=True))
    scale = jnp.exp(m_prev - m_new)
    p = jnp.exp(e - m_new)
    if h_resident:
        start = pl.multiple_of(j * tn, tn)
        h_blk = h_ref[pl.ds(start, tn), :]         # slice the VMEM-resident h
    else:
        h_blk = h_ref[...]
    acc_sc[...] = scale * acc_sc[...] + jnp.dot(
        p.astype(h_blk.dtype), h_blk, preferred_element_type=jnp.float32)
    m_sc[...] = m_new

    @pl.when(j == pl.num_programs(1) - 1)
    def _():
        acc = acc_sc[...]
        l = acc[:, ones_col:ones_col + 1]          # softmax denominator column
        inv = pl.reciprocal(l, approx=True)        # EUP slot (free-ish)
        if refine_recip:                           # only worth it on the f32 path
            inv = inv * (2.0 - l * inv)
        h_prime = acc * inv
        if apply_elu:
            # ELU as exp(min(x,0))-1 avoids exp overflow on the positive branch.
            h_prime = jnp.where(h_prime > 0, h_prime,
                                jnp.exp(jnp.minimum(h_prime, 0.0)) - 1.0)
        o_ref[...] = h_prime.astype(o_ref.dtype)


def _attention(f1, f2row, adj_mask, h_attn, *, tm, tn, f_aug, ones_col, concat,
               refine_recip, vmem_limit):
    n_pad = adj_mask.shape[0]
    grid = (n_pad // tm, n_pad // tn)

    # Deeper buffering on the dominant (adj) HBM stream once there is real DMA
    # latency to hide behind the short VPU softmax chain (matters most on v5e).
    adj_kwargs = {}
    if grid[1] >= 3:
        adj_kwargs["pipeline_mode"] = pl.Buffered(3)
    adj_spec = pl.BlockSpec((tm, tn), lambda i, j: (i, j), **adj_kwargs)

    # h stream: VMEM-resident (constant block index -> fetched once) when it fits,
    # otherwise stream (tn, F_aug) strips per column tile.
    h_bytes = h_attn.size * h_attn.dtype.itemsize
    h_resident = 2 * h_bytes <= max(8 * 1024 * 1024, vmem_limit // 4)
    if h_resident:
        h_spec = pl.BlockSpec((n_pad, f_aug), lambda i, j: (0, 0))
    else:
        # TODO(synk): for huge graphs, also raise tm to cut h re-streaming.
        h_spec = pl.BlockSpec((tn, f_aug), lambda i, j: (j, 0))

    kernel = functools.partial(
        _attention_kernel, apply_elu=concat, ones_col=ones_col, tn=tn,
        h_resident=h_resident, refine_recip=refine_recip)

    return pl.pallas_call(
        kernel,
        out_shape=jax.ShapeDtypeStruct((n_pad, f_aug), jnp.float32),
        grid_spec=pltpu.PrefetchScalarGridSpec(
            num_scalar_prefetch=0,
            grid=grid,
            in_specs=[
                pl.BlockSpec((tm, 1), lambda i, j: (i, 0)),   # f1 (query rows)
                pl.BlockSpec((1, tn), lambda i, j: (0, j)),   # f2 (key cols, row layout)
                adj_spec,                                     # int8 adjacency mask
                h_spec,                                       # h (+ ones column)
            ],
            out_specs=pl.BlockSpec((tm, f_aug), lambda i, j: (i, 0)),
            scratch_shapes=[
                pltpu.VMEM((tm, 1), jnp.float32),      # running row max
                pltpu.VMEM((tm, f_aug), jnp.float32),  # accumulator (+ denom column)
            ],
        ),
        compiler_params=pltpu.CompilerParams(
            dimension_semantics=("parallel", "arbitrary"),
            vmem_limit_bytes=vmem_limit,
        ),
    )(f1, f2row, adj_mask, h_attn)


# ---------------------------------------------------------------------------
# Wrapper
# ---------------------------------------------------------------------------
def build_adj_mask(adj):
    """Padded int8 adjacency mask. Compute ONCE per graph and share across
    layers/heads (avoids an N^2 f32 read + int8 write per layer call)."""
    n = adj.shape[0]
    n_pad = _round_up(n, LANE)
    mask = (adj > 0).astype(jnp.int8)
    return jnp.pad(mask, ((0, n_pad - n), (0, n_pad - n)))


def gat_forward(x, W, a, adj=None, *, adj_mask_pad=None,
                compute_dtype=jnp.bfloat16, concat=True, attn_tiles=None):
    """GAT layer forward (inference). Matches torch GraphAttentionLayer.forward."""
    N, F_in = x.shape
    F_out = W.shape[1]
    a1 = a[:F_out, :]
    a2 = a[F_out:, :]

    # Fold the two width-1 attention matvecs into the projection matmul:
    # W_aug = [W | W@a1 | W@a2]  =>  x @ W_aug = [h | f1 | f2].
    W_aug = jnp.concatenate([W, W @ a1, W @ a2], axis=1)        # (F_in, F_out+2)

    ones_col = F_out + 2                     # spare column that carries the denom
    F_aug = _round_up(F_out + 3, LANE)       # lane-dense width (>= ones_col+1)
    F_in_pad = _round_up(F_in, LANE)
    N_pad = _round_up(N, LANE)

    vmem_limit = _vmem_budget_bytes()
    big_vmem = vmem_limit > 48 * 1024 * 1024

    x_pad = jnp.pad(x, ((0, N_pad - N), (0, F_in_pad - F_in))).astype(compute_dtype)
    w_pad = jnp.pad(W_aug, ((0, F_in_pad - F_in),
                            (0, F_aug - (F_out + 2)))).astype(compute_dtype)

    if adj_mask_pad is None:
        adj_mask_pad = build_adj_mask(adj)
    assert adj_mask_pad.shape == (N_pad, N_pad), "precomputed mask has wrong padding"
    assert adj_mask_pad.dtype == jnp.int8, "precomputed mask must be int8"

    # --- kernel 1: projection (emits h_attn in compute_dtype + f32 f1/f2) -----
    tm_p = _pick_tm(N_pad, (512, 256, 128) if big_vmem else (256, 128))
    tk_p = _pick_tile(F_in_pad, (512, 256, 128))
    h_attn, f1, f2 = _projection(
        x_pad, w_pad, tm=tm_p, tk=tk_p, f_aug=F_aug, f_out=F_out,
        ones_col=ones_col, compute_dtype=compute_dtype, vmem_limit=vmem_limit)
    f2row = f2.T                                                # (1, N_pad), tiny

    # --- kernel 2: masked online-softmax attention + aggregation --------------
    if attn_tiles is not None:
        tm, tn = attn_tiles
    else:
        tm = _pick_tm(N_pad, (512, 256, 128) if big_vmem else (256, 128))
        tn = _pick_tile(N_pad, (2048, 1024, 512, 256, 128) if big_vmem
                        else (1024, 512, 256, 128))
    out_pad = _attention(
        f1, f2row, adj_mask_pad, h_attn, tm=tm, tn=tn, f_aug=F_aug,
        ones_col=ones_col, concat=concat,
        refine_recip=(np.dtype(compute_dtype) == np.dtype(np.float32)),
        vmem_limit=vmem_limit)

    return out_pad[:N, :F_out]


# ---------------------------------------------------------------------------
# Reference + test
# ---------------------------------------------------------------------------
def _xavier_uniform(key, shape, gain):
    fan_in, fan_out = shape
    bound = gain * np.sqrt(6.0 / (fan_in + fan_out))
    return jax.random.uniform(key, shape, jnp.float32, -bound, bound)


def gat_reference(x, W, a, adj, concat=True):
    # Pure-JAX mirror of the torch forward (eval mode).
    h = x @ W
    N = h.shape[0]
    F_out = W.shape[1]
    a_in = jnp.concatenate(
        [jnp.repeat(h, N, axis=0), jnp.tile(h, (N, 1))], axis=1
    ).reshape(N, N, 2 * F_out)
    e = jnp.squeeze(a_in @ a, axis=2)
    e = jnp.where(e > 0, e, ALPHA * e)
    att = jnp.where(adj > 0, e, NEG_INF * jnp.ones_like(e))
    att = jax.nn.softmax(att, axis=1)
    hp = att @ h
    if concat:
        return jnp.where(hp > 0, hp, jnp.exp(jnp.minimum(hp, 0.0)) - 1.0)
    return hp


def _make_case(key, N, F_IN, F_OUT):
    k_w, k_a, k_x, k_adj = jax.random.split(key, 4)
    W = _xavier_uniform(k_w, (F_IN, F_OUT), gain=1.414)
    a = _xavier_uniform(k_a, (2 * F_OUT, 1), gain=1.414)
    x = jax.random.normal(k_x, (N, F_IN), jnp.float32)
    adj = (jax.random.uniform(k_adj, (N, N)) > 0.5).astype(jnp.float32)
    adj = jnp.maximum(adj, jnp.eye(N, dtype=jnp.float32))   # self loops
    return x, W, a, adj


if __name__ == "__main__":
    key = jax.random.PRNGKey(0)
    k_small, k_med = jax.random.split(key)

    # --- small case ------------------------------------------------------------
    N, F_IN, F_OUT = 8, 16, 32
    x, W, a, adj = _make_case(k_small, N, F_IN, F_OUT)
    adj_mask = build_adj_mask(adj)            # built once, shared across calls

    ref = jax.block_until_ready(gat_reference(x, W, a, adj, concat=True))

    out_f32 = jax.block_until_ready(
        gat_forward(x, W, a, adj_mask_pad=adj_mask, compute_dtype=jnp.float32))
    np.testing.assert_allclose(np.asarray(out_f32), np.asarray(ref),
                               rtol=2e-3, atol=2e-3)

    out_bf16 = jax.block_until_ready(
        gat_forward(x, W, a, adj_mask_pad=adj_mask, compute_dtype=jnp.bfloat16))
    np.testing.assert_allclose(np.asarray(out_bf16), np.asarray(ref),
                               rtol=6e-2, atol=6e-2)

    ref_nc = jax.block_until_ready(gat_reference(x, W, a, adj, concat=False))
    out_nc = jax.block_until_ready(
        gat_forward(x, W, a, adj_mask_pad=adj_mask, compute_dtype=jnp.float32,
                    concat=False))
    np.testing.assert_allclose(np.asarray(out_nc), np.asarray(ref_nc),
                               rtol=2e-3, atol=2e-3)

    # --- medium case: exercises multi-tile grids, the online-softmax recurrence,
    # the deeper-buffered adj stream and the resident-h dynamic slicing ----------
    N2, F_IN2, F_OUT2 = 512, 300, 32
    x2, W2, a2, adj2 = _make_case(k_med, N2, F_IN2, F_OUT2)
    adj_mask2 = build_adj_mask(adj2)
    ref2 = jax.block_until_ready(gat_reference(x2, W2, a2, adj2, concat=True))
    out2 = jax.block_until_ready(
        gat_forward(x2, W2, a2, adj_mask_pad=adj_mask2, compute_dtype=jnp.float32,
                    attn_tiles=(128, 128)))
    np.testing.assert_allclose(np.asarray(out2), np.asarray(ref2),
                               rtol=5e-3, atol=5e-3)

    print("KERNEL_OK")
</pallas_src>

<mosaic_0001>
module attributes {stable_mosaic.version = 11 : i64} {
  func.func @_projection_kernel(%arg0: i32, %arg1: i32, %arg2: memref<64x128xf32, #tpu.memory_space<vmem>>, %arg3: memref<128x128xf32, #tpu.memory_space<vmem>>, %arg4: memref<64x128xf32, #tpu.memory_space<vmem>>, %arg5: memref<64x1xf32, #tpu.memory_space<vmem>>, %arg6: memref<64x1xf32, #tpu.memory_space<vmem>>, %arg7: memref<64x128xf32, #tpu.memory_space<vmem>>) attributes {dimension_semantics = [#tpu.dimension_semantics<parallel>, #tpu.dimension_semantics<arbitrary>], iteration_bounds = array<i64: 2, 1>, scalar_prefetch = 0 : i64, scratch_operands = 1 : i64, tpu.core_type = #tpu.core_type<tc>, window_params = [{transform_indices = @transform_0, window_bounds = array<i64: 64, 128>}, {transform_indices = @transform_1, window_bounds = array<i64: 128, 128>}, {transform_indices = @transform_2, window_bounds = array<i64: 64, 128>}, {transform_indices = @transform_3, window_bounds = array<i64: 64, 1>}, {transform_indices = @transform_4, window_bounds = array<i64: 64, 1>}]} {
    %c0_i32 = arith.constant 0 : i32
    %0 = arith.cmpi eq, %arg1, %c0_i32 : i32
    %1 = arith.extui %0 : i1 to i32
    %c0_i32_0 = arith.constant 0 : i32
    %2 = arith.cmpi ne, %1, %c0_i32_0 : i32
    scf.if %2 {
      %cst_10 = arith.constant 0.000000e+00 : f32
      %12 = vector.broadcast %cst_10 : f32 to vector<64x128xf32>
      %c0_11 = arith.constant 0 : index
      %c0_12 = arith.constant 0 : index
      %13 = vector.load %arg7[%c0_11, %c0_12] : memref<64x128xf32, #tpu.memory_space<vmem>>, vector<64x128xf32>
      tpu.vector_store %arg7[%c0_11, %c0_12], %12 {strides = array<i32>} : memref<64x128xf32, #tpu.memory_space<vmem>>, vector<64x128xf32>,
    } else {
    }
    %c0 = arith.constant 0 : index
    %c0_1 = arith.constant 0 : index
    %3 = vector.load %arg7[%c0, %c0_1] : memref<64x128xf32, #tpu.memory_space<vmem>>, vector<64x128xf32>
    %c0_2 = arith.constant 0 : index
    %c0_3 = arith.constant 0 : index
    %4 = vector.load %arg2[%c0_2, %c0_3] : memref<64x128xf32, #tpu.memory_space<vmem>>, vector<64x128xf32>
    %c0_4 = arith.constant 0 : index
    %c0_5 = arith.constant 0 : index
    %5 = vector.load %arg3[%c0_4, %c0_5] : memref<128x128xf32, #tpu.memory_space<vmem>>, vector<128x128xf32>
    %cst = arith.constant dense<0.000000e+00> : vector<64x128xf32>
    %6 = tpu.matmul %4, %5, %cst {dimension_numbers = #tpu.dot_dimension_numbers<[1], [0], [0], [1], [0, 0, 1, 1], [], []>} : vector<64x128xf32>, vector<128x128xf32>, vector<64x128xf32> -> vector<64x128xf32>
    %7 = arith.addf %3, %6 : vector<64x128xf32>
    %c0_6 = arith.constant 0 : index
    %c0_7 = arith.constant 0 : index
    %8 = vector.load %arg7[%c0_6, %c0_7] : memref<64x128xf32, #tpu.memory_space<vmem>>, vector<64x128xf32>
    tpu.vector_store %arg7[%c0_6, %c0_7], %7 {strides = array<i32>} : memref<64x128xf32, #tpu.memory_space<vmem>>, vector<64x128xf32>,
    %c0_i32_8 = arith.constant 0 : i32
    %9 = arith.cmpi eq, %arg1, %c0_i32_8 : i32
    %10 = arith.extui %9 : i1 to i32
    %c0_i32_9 = arith.constant 0 : i32
    %11 = arith.cmpi ne, %10, %c0_i32_9 : i32
    scf.if %11 {
      %c0_10 = arith.constant 0 : index
      %c0_11 = arith.constant 0 : index
      %12 = vector.load %arg7[%c0_10, %c0_11] : memref<64x128xf32, #tpu.memory_space<vmem>>, vector<64x128xf32>
      %13 = vector.extract_strided_slice %12 {offsets = [0, 32], sizes = [64, 1], strides = [1, 1]} : vector<64x128xf32> to vector<64x1xf32>
      %c0_12 = arith.constant 0 : index
      %c0_13 = arith.constant 0 : index
      %14 = vector.load %arg5[%c0_12, %c0_13] : memref<64x1xf32, #tpu.memory_space<vmem>>, vector<64x1xf32>
      tpu.vector_store %arg5[%c0_12, %c0_13], %13 {strides = array<i32>} : memref<64x1xf32, #tpu.memory_space<vmem>>, vector<64x1xf32>,
      %15 = vector.extract_strided_slice %12 {offsets = [0, 33], sizes = [64, 1], strides = [1, 1]} : vector<64x128xf32> to vector<64x1xf32>
      %c0_14 = arith.constant 0 : index
      %c0_15 = arith.constant 0 : index
      %16 = vector.load %arg6[%c0_14, %c0_15] : memref<64x1xf32, #tpu.memory_space<vmem>>, vector<64x1xf32>
      tpu.vector_store %arg6[%c0_14, %c0_15], %15 {strides = array<i32>} : memref<64x1xf32, #tpu.memory_space<vmem>>, vector<64x1xf32>,
      %17 = tpu.iota {dimensions = array<i32: 1>} : vector<64x128xi32>
      %c34_i32 = arith.constant 34 : i32
      %18 = vector.broadcast %c34_i32 : i32 to vector<64x128xi32>
      %19 = arith.cmpi eq, %17, %18 : vector<64x128xi32>
      %cst_16 = arith.constant 1.000000e+00 : f32
      %20 = vector.broadcast %cst_16 : f32 to vector<64x128xf32>
      %21 = arith.select %19, %20, %12 : vector<64x128xi1>, vector<64x128xf32>
      %c0_17 = arith.constant 0 : index
      %c0_18 = arith.constant 0 : index
      %22 = vector.load %arg4[%c0_17, %c0_18] : memref<64x128xf32, #tpu.memory_space<vmem>>, vector<64x128xf32>
      tpu.vector_store %arg4[%c0_17, %c0_18], %21 {strides = array<i32>} : memref<64x128xf32, #tpu.memory_space<vmem>>, vector<64x128xf32>,
    } else {
    }
    return
  }
  func.func @transform_0(%arg0: i32, %arg1: i32) -> (i32, i32) {
    %c0_i32 = arith.constant 0 : i32
    return %arg0, %arg1 : i32, i32
  }
  func.func @transform_1(%arg0: i32, %arg1: i32) -> (i32, i32) {
    %c0_i32 = arith.constant 0 : i32
    %c0_i32_0 = arith.constant 0 : i32
    return %arg1, %c0_i32 : i32, i32
  }
  func.func @transform_2(%arg0: i32, %arg1: i32) -> (i32, i32) {
    %c0_i32 = arith.constant 0 : i32
    %c0_i32_0 = arith.constant 0 : i32
    return %arg0, %c0_i32 : i32, i32
  }
  func.func @transform_3(%arg0: i32, %arg1: i32) -> (i32, i32) {
    %c0_i32 = arith.constant 0 : i32
    %c0_i32_0 = arith.constant 0 : i32
    return %arg0, %c0_i32 : i32, i32
  }
  func.func @transform_4(%arg0: i32, %arg1: i32) -> (i32, i32) {
    %c0_i32 = arith.constant 0 : i32
    %c0_i32_0 = arith.constant 0 : i32
    return %arg0, %c0_i32 : i32, i32
  }
}

</mosaic_0001>

<bundles_post_ra>
// kernel: tpu_custom_call.1
= control target key start
LH: loop header
LB: loop body
LE: loop exit
PB: predicated region body
PF: predicated region fallthrough
CT: control target
= control target key end

     0   :  { %s1238_s0 = inlined_call_operand.hbm [shape: f32[128,128], index: 0, kind: input, shape index: {}]   ;;  %s1239_s1 = inlined_call_operand.hbm [shape: f32[128,128], index: 1, kind: input, shape index: {}]   ;;  %s1240_s2 = inlined_call_operand.hbm [shape: f32[128,128], index: 2, kind: output, shape index: {0}]   ;;  %s1241_s3 = inlined_call_operand.vmem [shape: f32[128,1], index: 3, kind: output, shape index: {1}]   ;;  %s1242_s4 = inlined_call_operand.vmem [shape: f32[128,1], index: 4, kind: output, shape index: {2}]  }
   0x1   :  { %1246 = sst [smem:[#allocation13_spill]] %s1239_s1 }
   0x2   :  { %10 = vsyncpa [#allocation4], 0 }
   0x3   :  { %12 = vsyncpa [#allocation4 + $0x1], 0 }
   0x4   :  { %13 = vsyncpa [#allocation7], 0 }
   0x5   :  { %14 = vsyncpa [#allocation5], 0 }
   0x6   :  { %16 = vsyncpa [#allocation5 + $0x1], 0  ;;  %s1001_s15 = smov 0   ;;  %s1003_s16 = smov 0  }
   0x7   :  { %s1005_s17 = smov 0   ;;  %s1007_s18 = smov 0  }
   0x8   :  { %s1009_s19 = smov 0   ;;  %s1011_s20 = smov 0  }
   0x9 LB: > { %s671_s21 = sadd.s32 4294967295, %s967_s20   ;;  %s672_s22 = sadd.s32 4294967294, %s967_s20   ;;  %s967_s20 = sphi %s1011_s20, %s22_s20   ;;  %s963_s19 = sphi %s1009_s19, %s1263_s19   ;;  %s959_s18 = sphi %s1007_s18, %s1262_s18   ;;  %s955_s17 = sphi %s1005_s17, %s1261_s17   ;;  %s951_s16 = sphi %s1003_s16, %s1260_s16   ;;  %s947_s15 = sphi %s1001_s15, %s1259_s15  }
   0xa   : > { %p56_p0 = scmp.ne.s32.totalorder %s951_s16, %s947_s15  ;;  %p1035_p1 = scmp.eq.s32.totalorder %s671_s21, 0 }
   0xb   : > { %p1039_p2 = scmp.eq.s32.totalorder %s671_s21, 1  ;;  %p112_p3 = scmp.eq.s32.totalorder %s672_s22, 1 }
   0xc   : > { %p1045_p4 = por %p1035_p1, %p56_p0  ;;  %p673_p5 = scmp.ge.s32.totalorder %s967_s20, 1 }
   0xd   : > { %p1050_p6 = por %p112_p3, %p56_p0  ;;  %p171_p7 = scmp.lt.s32.totalorder %s967_s20, 3 }
   0xe   : > { %s1251_s1 = sld [smem:[#allocation13_spill]]  ;;  %s969_s5 = smov [#allocation6]  }
   0xf   : > { %p1058_p8 = pnand %p673_p5, %p171_p7  ;;  %s187_s6 = sshll.u32 %s969_s5, 4  ;;  %s188_s6 = int_to_ptr.vmem [resolvable:$true] %s187_s6 }
  0x10   : > { %p675_p11 = scmp.ge.s32.totalorder %s967_s20, 2  ;;  %s1243_s7 = smov 128  }
  0x11   : > { %p750_p9 = pneg %p1058_p8  ;;  %s1244_s8 = smov 8  }
  0x12   : > { %s34_s9 = sadd.s32 1, %s963_s19  ;;  %s43_s10 = sadd.s32 1, %s955_s17 }
  0x13   : > { %p751_p10 = pnand %p750_p9, %p1035_p1  ;;  %p36_p12 = scmp.ge.s32.totalorder %s34_s9, 2 }
  0x14   : > { %s185_s29 = sshll.u32 %s1251_s1, 4  ;;  %p50_p13 = scmp.ne.s32.totalorder %s955_s17, %s951_s16  ;;  %s186_s29 = int_to_ptr.hbm [resolvable:$true] %s185_s29 }
  0x15   : > { %753 = dma.hbm_to_vmem [thread:$0]  (!%p751_p10), %s186_s29, 2048, %s188_s6, [#allocation7], %s1243_s7, %s1243_s7, %s1244_s8  }
  0x16   : > { %p51_p0 = scmp.eq.s32.totalorder %s967_s20, 0  ;;  %s1265_s9 = smov (%p36_p12, %s34_s9), 0 }
  0x17   : > { %1253 = sst [smem:[#allocation12_spill]] %s1265_s9  ;;  %p1083_p5 = por %p1039_p2, %p50_p13 }
  0x18   : > { %p1077_p3 = por %p51_p0, %p50_p13  ;;  %s38_s13 = ssub.s32 %s963_s19, %s1265_s9 }
  0x19   : > { %p763_p7 = scmp.lt.s32.totalorder %s967_s20, 2  ;;  %p41_p9 = scmp.eq.s32.totalorder %s38_s13, 0 }
  0x1a   : > { %s201_s14 = sand.u32 1, %s955_s17   ;;  %s692_s27 = sshll.u32 %s963_s19, 6 }
  0x1b   : > { %s676_s21 = sshll.u32 %s201_s14, 6  ;;  %s211_s5 = scalar_lea.hbm %s1238_s0, %s692_s27 }
  0x1c   : > { %s1092_s22 = scalar_select %p41_p9, %s955_s17, %s43_s10  }
  0x1d   : > { %s205_s6 = scalar_lea.vmem [#allocation3], %s676_s21  ;;  %s212_s24 = sshll.u32 %s211_s5, 4  ;;  %s213_s24 = int_to_ptr.hbm [resolvable:$true] %s212_s24 }
  0x1e   : > { %s214_s7 = sshll.u32 %s205_s6, 4  ;;  %p755_p2 = pnand %p763_p7, %p1077_p3  ;;  %s215_s7 = int_to_ptr.vmem [resolvable:$true] %s214_s7 }
  0x1f   : > { %s202_s8 = scalar_lea.sflag [#allocation4], %s201_s14  ;;  %s1256_s1 = smov 8  }
  0x20   : > { %s1257_s9 = smov 128   ;;  %226 = sbr.rel (%p1058_p8) target bundleno = 355 (0x163), region = 28 }
  0x21   : > { %757 = dma.hbm_to_vmem [thread:$0]  (!%p755_p2), %s213_s24, 1024, %s215_s7, %s202_s8, %s1257_s9, %s1257_s9, %s1256_s1  }
  0x22   : > { %s1106_s10 = sand.u32 (!%p1058_p8), 1, %s951_s16  }
  0x23   : > { %s680_s13 = sshll.u32 (!%p1058_p8), %s1106_s10, 6  ;;  %s229_s21 = scalar_lea.sflag (!%p1058_p8), [#allocation4], %s1106_s10 }
  0x24   : > { %s1112_s11 = scalar_lea.vmem (!%p1058_p8), [#allocation3], %s680_s13 }
  0x25   : > { %934 = dma.done.wait (%p1045_p4), %s229_s21, 1024  }
  0x26   : > { %936 = vsyncadd (%p1045_p4), %s229_s21, 4294966272 }
  0x27   : > { %938 = dma.done.wait (%p1035_p1), [#allocation7], 2048  }
  0x28   : > { %940 = vsyncadd (%p1035_p1), [#allocation7], 4294965248  ;;  %v331_v0 = vld [vmem:[#allocation6 + $0x78] sm:$0xff]  ;;  %v330_v1 = vld [vmem:[#allocation6 + $0x70] sm:$0xff]  ;;  %v473_v24 = vlaneseq  ;;  %s972_s1 = smov 96   ;;  %s973_s23 = smov 95  }
  0x29   : > { %332 = vmatpush.msra.mxu0 %v331_v0  ;;  %694 = vmatpush.msra.mxu1 %v331_v0  ;;  %v329_v2 = vld [vmem:[#allocation6 + $0x68] sm:$0xff]  ;;  %v328_v3 = vld [vmem:[#allocation6 + $0x60] sm:$0xff]  ;;  %v327_v4 = vld [vmem:[#allocation6 + $0x58] sm:$0xff]  ;;  %s1136_s25 = scalar_lea.vmem [#allocation8], %s680_s13  ;;  %s693_s7 = sshll.u32 %s959_s18, 6 }
  0x2a   : > { %695 = vmatpush.msra.mxu2 %v331_v0  ;;  %696 = vmatpush.msra.mxu3 %v331_v0  ;;  %v326_v5 = vld [vmem:[#allocation6 + $0x50] sm:$0xff]  ;;  %v325_v6 = vld [vmem:[#allocation6 + $0x48] sm:$0xff]  ;;  %v324_v7 = vld [vmem:[#allocation6 + $0x40] sm:$0xff]  ;;  %v474_v25 = vand.u32 127, %v473_v24  ;;  %s515_s30 = sshll.u32 %s1136_s25, 4  ;;  %s514_s14 = scalar_lea.hbm %s1240_s2, %s693_s7  ;;  %s516_s30 = int_to_ptr.vmem [resolvable:$true] %s515_s30 }
  0x2b   : > { %333 = vmatpush.msra.mxu0 %v330_v1  ;;  %697 = vmatpush.msra.mxu1 %v330_v1  ;;  %v323_v8 = vld [vmem:[#allocation6 + $0x38] sm:$0xff]  ;;  %v322_v9 = vld [vmem:[#allocation6 + $0x30] sm:$0xff]  ;;  %v321_v10 = vld [vmem:[#allocation6 + $0x28] sm:$0xff]  ;;  %s517_s27 = sshll.u32 %s514_s14, 4  ;;  %s493_s28 = scalar_lea.sflag [#allocation5], %s1106_s10  ;;  %s518_s27 = int_to_ptr.hbm [resolvable:$true] %s517_s27 }
  0x2c   : > { %698 = vmatpush.msra.mxu2 %v330_v1  ;;  %699 = vmatpush.msra.mxu3 %v330_v1  ;;  %v320_v11 = vld [vmem:[#allocation6 + $0x20] sm:$0xff]  ;;  %v319_v12 = vld [vmem:[#allocation6 + $0x18] sm:$0xff]  ;;  %v318_v13 = vld [vmem:[#allocation6 + $0x10] sm:$0xff]  ;;  %vm475_vm0 = vcmp.eq.s32.totalorder %v474_v25, 34  ;;  %s895_s29 = sshra.s32 %s518_s27, 4  ;;  %s901_s13 = scalar_lea.hbm %s1240_s2, 128  ;;  %s896_s29 = int_to_ptr.hbm [resolvable:$true] %s895_s29 }
  0x2d   : > { %334 = vmatpush.msra.mxu0 %v329_v2  ;;  %700 = vmatpush.msra.mxu1 %v329_v2  ;;  %v317_v14 = vld [vmem:[#allocation6 + $0x8] sm:$0xff]  ;;  %v316_v15 = vld [vmem:[#allocation6] sm:$0xff]  ;;  %v310_v17 = vld [vmem:[%s1112_s11 + $0x10] sm:$0xff]  ;;  %s897_s5 = scalar_lea.hbm %s896_s29, 64  ;;  %p902_p10 = scmp.lt.s32.totalorder %s896_s29, %s1240_s2 }
  0x2e   : > { %701 = vmatpush.msra.mxu2 %v329_v2  ;;  %702 = vmatpush.msra.mxu3 %v329_v2  ;;  %v308_v16 = vld [vmem:[%s1112_s11] sm:$0xff]  ;;  %v314_v19 = vld [vmem:[%s1112_s11 + $0x30] sm:$0xff]  ;;  %v311_v20 = vld [vmem:[%s1112_s11 + $0x18] sm:$0xff]  ;;  %p898_p1 = scmp.ne.s32.totalorder %s896_s29, %s897_s5  ;;  %p903_p12 = scmp.lt.s32.totalorder %s901_s13, %s897_s5 }
  0x2f   : > { %335 = vmatpush.msra.mxu0 %v328_v3  ;;  %703 = vmatpush.msra.mxu1 %v328_v3  ;;  %v312_v18 = vld [vmem:[%s1112_s11 + $0x20] sm:$0xff]  ;;  %v309_v21 = vld [vmem:[%s1112_s11 + $0x8] sm:$0xff]  ;;  %v315_v23 = vld [vmem:[%s1112_s11 + $0x38] sm:$0xff] }
  0x30   : > { %704 = vmatpush.msra.mxu2 %v328_v3  ;;  %705 = vmatpush.msra.mxu3 %v328_v3  ;;  %v313_v22 = vld [vmem:[%s1112_s11 + $0x28] sm:$0xff]  ;;  %p899_p4 = pnand %p898_p1, %p1083_p5  ;;  %p904_p13 = por %p903_p12, %p902_p10 }
  0x31   : > { %336 = vmatpush.msra.mxu0 %v327_v4  ;;  %706 = vmatpush.msra.mxu1 %v327_v4 }
  0x32   : > { %707 = vmatpush.msra.mxu2 %v327_v4  ;;  %708 = vmatpush.msra.mxu3 %v327_v4  ;;  %p900_p8 = pneg %p899_p4 }
  0x33   : > { %337 = vmatpush.msra.mxu0 %v326_v5  ;;  %709 = vmatpush.msra.mxu1 %v326_v5 }
  0x34   : > { %710 = vmatpush.msra.mxu2 %v326_v5  ;;  %711 = vmatpush.msra.mxu3 %v326_v5  ;;  %p905_p0 = pnand %p904_p13, %p900_p8 }
  0x35   : > { %338 = vmatpush.msra.mxu0 %v325_v6  ;;  %712 = vmatpush.msra.mxu1 %v325_v6 }
  0x36   : > { %713 = vmatpush.msra.mxu2 %v325_v6  ;;  %714 = vmatpush.msra.mxu3 %v325_v6 }
  0x37   : > { %339 = vmatpush.msra.mxu0 %v324_v7  ;;  %715 = vmatpush.msra.mxu1 %v324_v7 }
  0x38   : > { %716 = vmatpush.msra.mxu2 %v324_v7  ;;  %717 = vmatpush.msra.mxu3 %v324_v7 }
  0x39   : > { %340 = vmatpush.msra.mxu0 %v323_v8  ;;  %718 = vmatpush.msra.mxu1 %v323_v8 }
  0x3a   : > { %719 = vmatpush.msra.mxu2 %v323_v8  ;;  %720 = vmatpush.msra.mxu3 %v323_v8 }
  0x3b   : > { %341 = vmatpush.msra.mxu0 %v322_v9  ;;  %721 = vmatpush.msra.mxu1 %v322_v9 }
  0x3c   : > { %722 = vmatpush.msra.mxu2 %v322_v9  ;;  %723 = vmatpush.msra.mxu3 %v322_v9 }
  0x3d   : > { %342 = vmatpush.msra.mxu0 %v321_v10  ;;  %724 = vmatpush.msra.mxu1 %v321_v10 }
  0x3e   : > { %725 = vmatpush.msra.mxu2 %v321_v10  ;;  %726 = vmatpush.msra.mxu3 %v321_v10 }
  0x3f   : > { %343 = vmatpush.msra.mxu0 %v320_v11  ;;  %727 = vmatpush.msra.mxu1 %v320_v11 }
  0x40   : > { %728 = vmatpush.msra.mxu2 %v320_v11  ;;  %729 = vmatpush.msra.mxu3 %v320_v11 }
  0x41   : > { %344 = vmatpush.msra.mxu0 %v319_v12  ;;  %730 = vmatpush.msra.mxu1 %v319_v12 }
  0x42   : > { %731 = vmatpush.msra.mxu2 %v319_v12  ;;  %732 = vmatpush.msra.mxu3 %v319_v12 }
  0x43   : > { %345 = vmatpush.msra.mxu0 %v318_v13  ;;  %733 = vmatpush.msra.mxu1 %v318_v13 }
  0x44   : > { %734 = vmatpush.msra.mxu2 %v318_v13  ;;  %735 = vmatpush.msra.mxu3 %v318_v13 }
  0x45   : > { %346 = vmatpush.msra.mxu0 %v317_v14  ;;  %736 = vmatpush.msra.mxu1 %v317_v14 }
  0x46   : > { %737 = vmatpush.msra.mxu2 %v317_v14  ;;  %738 = vmatpush.msra.mxu3 %v317_v14 }
  0x47   : > { %347 = vmatpush.msra.mxu0 %v316_v15  ;;  %739 = vmatpush.msra.mxu1 %v316_v15 }
  0x48   : > { %348 = vmatmul.f32.vlgmr.msra.gmra.mxu0 %v308_v16  ;;  %354 = vmatmul.f32.vlgmr.msra.gmra.mxu1 %v310_v17 }
  0x49   : > { %740 = vmatpush.msra.mxu2 %v316_v15  ;;  %741 = vmatpush.msra.mxu3 %v316_v15 }
  0x4a   : > { %360 = vmatmul.f32.vlgmr.msra.gmra.mxu2 %v312_v18  ;;  %366 = vmatmul.f32.vlgmr.msra.gmra.mxu3 %v314_v19 }
  0x50   : > { %357 = vmatmul.f32.gmra.mxu1 %v311_v20  ;;  %351 = vmatmul.f32.gmra.mxu0 %v309_v21 }
  0x52   : > { %363 = vmatmul.f32.gmra.mxu2 %v313_v22  ;;  %369 = vmatmul.f32.gmra.mxu3 %v315_v23 }
  0xc5   : > { %v349_v26 = vpop.f32.mrf.mxu0  ;;  %v355_v27 = vpop.f32.mrf.mxu1 }
  0xc6   : > { %v476_v28 = vsel %vm475_vm0, 1.0, %v349_v26  ;;  %v478_v29 = vsel %vm475_vm0, 1.0, %v355_v27  ;;  %412 = vrot.lane.b32.xlu1 %v355_v27, %s972_s1  ;;  %441 = vrot.lane.b32.xlu2 %v349_v26, %s973_s23 }
  0xc7   : > { %484 = vst [vmem:[%s1136_s25] sm:$0xff] %v476_v28  ;;  %408 = vrot.lane.b32.xlu0 %v349_v26, %s972_s1 }
  0xc8   : > { %486 = vst [vmem:[%s1136_s25 + $0x10] sm:$0xff] %v478_v29 }
  0xcd   : > { %v361_v30 = vpop.f32.mrf.mxu2  ;;  %v367_v31 = vpop.f32.mrf.mxu3 }
  0xce   : > { %v480_v32 = vsel %vm475_vm0, 1.0, %v361_v30  ;;  %v482_v33 = vsel %vm475_vm0, 1.0, %v367_v31  ;;  %445 = vrot.lane.b32.xlu1 %v355_v27, %s973_s23  ;;  %416 = vrot.lane.b32.xlu2 %v361_v30, %s972_s1  ;;  %v358_v34 = vpop.f32.mrf.mxu1  ;;  %v352_v35 = vpop.f32.mrf.mxu0 }
  0xcf   : > { %488 = vst [vmem:[%s1136_s25 + $0x20] sm:$0xff] %v480_v32  ;;  %420 = vrot.lane.b32.xlu0 %v367_v31, %s972_s1  ;;  %v479_v36 = vsel %vm475_vm0, 1.0, %v358_v34  ;;  %v477_v37 = vsel %vm475_vm0, 1.0, %v352_v35 }
  0xd0   : > { %490 = vst [vmem:[%s1136_s25 + $0x30] sm:$0xff] %v482_v33 }
  0xd1   : > { %487 = vst [vmem:[%s1136_s25 + $0x18] sm:$0xff] %v479_v36 }
  0xd2   : > { %485 = vst [vmem:[%s1136_s25 + $0x8] sm:$0xff] %v477_v37 }
  0xd5   : > { %v364_v38 = vpop.f32.mrf.mxu2  ;;  %v370_v39 = vpop.f32.mrf.mxu3 }
  0xd6   : > { %447 = vrot.lane.b32.xlu2 %v358_v34, %s973_s23  ;;  %v481_v40 = vsel %vm475_vm0, 1.0, %v364_v38  ;;  %414 = vrot.lane.b32.xlu1 %v358_v34, %s972_s1  ;;  %v483_v41 = vsel %vm475_vm0, 1.0, %v370_v39 }
  0xd7   : > { %449 = vrot.lane.b32.xlu0 %v361_v30, %s973_s23  ;;  %489 = vst [vmem:[%s1136_s25 + $0x28] sm:$0xff] %v481_v40 }
  0xd8   : > { %491 = vst [vmem:[%s1136_s25 + $0x38] sm:$0xff] %v483_v41 }
  0xde   : > { %418 = vrot.lane.b32.xlu2 %v364_v38, %s972_s1  ;;  %422 = vrot.lane.b32.xlu1 %v370_v39, %s972_s1 }
  0xdf   : > { %410 = vrot.lane.b32.xlu0 %v352_v35, %s972_s1 }
  0xe0   : > { %908 = shalt.err (!%p905_p0)
}
  0xe1   : > { %s974_s10 = smov 128   ;;  %s975_s1 = smov 8   ;;  %vm432_vm1 = vcmask 7168  }
  0xe2   : > { %748 = dma.vmem_to_hbm [thread:$0]  (%p1083_p5), %s516_s30, 1024, %s518_s27, %s493_s28, %s974_s10, %s974_s10, %s975_s1  }
  0xe3   : > { %s683_s25 = sshll.u32 %s959_s18, 3 }
  0xe4   : > { %p277_p3 = scmp.lt.s32.totalorder %s683_s25, 15 }
  0xe6   : > { %453 = vrot.lane.b32.xlu2 %v367_v31, %s973_s23  ;;  %451 = vrot.lane.b32.xlu1 %v364_v38, %s973_s23  ;;  %s1267_s25 = smov (!%p277_p3, %s683_s25), 15 }
  0xe7   : > { %443 = vrot.lane.b32.xlu0 %v352_v35, %s973_s23  ;;  %s684_s7 = sshll.u32 %s1267_s25, 3 }
  0xe8   : > { %s1186_s14 = scalar_lea.vmem %s1242_s4, %s684_s7  ;;  %s280_s18 = scalar_lea.vmem %s1241_s3, %s684_s7 }
  0xef   : > { %455 = vrot.lane.b32.xlu0 %v370_v39, %s973_s23 }
 0x120   : > { %v442_v42 = vpop.permute.xlu2 %441 }
 0x121   : > { %465 = vst.msk [vmem:[%s1186_s14] sm:$0xff] %vm432_vm1, %v442_v42 }
 0x128   : > { %v417_v43 = vpop.permute.xlu2 %416 }
 0x129   : > { %437 = vst.msk [vmem:[%s280_s18 + $0x20] sm:$0xff] %vm432_vm1, %v417_v43 }
 0x130   : > { %v448_v44 = vpop.permute.xlu2 %447 }
 0x131   : > { %468 = vst.msk [vmem:[%s1186_s14 + $0x18] sm:$0xff] %vm432_vm1, %v448_v44 }
 0x138   : > { %v413_v45 = vpop.permute.xlu1 %412  ;;  %v419_v46 = vpop.permute.xlu2 %418 }
 0x139   : > { %435 = vst.msk [vmem:[%s280_s18 + $0x10] sm:$0xff] %vm432_vm1, %v413_v45  ;;  %v409_v47 = vpop.permute.xlu0 %408 }
 0x13a   : > { %438 = vst.msk [vmem:[%s280_s18 + $0x28] sm:$0xff] %vm432_vm1, %v419_v46 }
 0x13b   : > { %433 = vst.msk [vmem:[%s280_s18] sm:$0xff] %vm432_vm1, %v409_v47 }
 0x140   : > { %v446_v48 = vpop.permute.xlu1 %445  ;;  %v454_v49 = vpop.permute.xlu2 %453 }
 0x141   : > { %467 = vst.msk [vmem:[%s1186_s14 + $0x10] sm:$0xff] %vm432_vm1, %v446_v48  ;;  %v421_v50 = vpop.permute.xlu0 %420 }
 0x142   : > { %471 = vst.msk [vmem:[%s1186_s14 + $0x30] sm:$0xff] %vm432_vm1, %v454_v49 }
 0x143   : > { %439 = vst.msk [vmem:[%s280_s18 + $0x30] sm:$0xff] %vm432_vm1, %v421_v50 }
 0x148   : > { %v415_v51 = vpop.permute.xlu1 %414 }
 0x149   : > { %v450_v52 = vpop.permute.xlu0 %449  ;;  %436 = vst.msk [vmem:[%s280_s18 + $0x18] sm:$0xff] %vm432_vm1, %v415_v51 }
 0x14a   : > { %469 = vst.msk [vmem:[%s1186_s14 + $0x20] sm:$0xff] %vm432_vm1, %v450_v52 }
 0x150   : > { %v423_v53 = vpop.permute.xlu1 %422 }
 0x151   : > { %v411_v54 = vpop.permute.xlu0 %410  ;;  %440 = vst.msk [vmem:[%s280_s18 + $0x38] sm:$0xff] %vm432_vm1, %v423_v53 }
 0x152   : > { %434 = vst.msk [vmem:[%s280_s18 + $0x8] sm:$0xff] %vm432_vm1, %v411_v54 }
 0x158   : > { %v452_v55 = vpop.permute.xlu1 %451 }
 0x159   : > { %v444_v56 = vpop.permute.xlu0 %443  ;;  %470 = vst.msk [vmem:[%s1186_s14 + $0x28] sm:$0xff] %vm432_vm1, %v452_v55 }
 0x15a   : > { %466 = vst.msk [vmem:[%s1186_s14 + $0x8] sm:$0xff] %vm432_vm1, %v444_v56 }
 0x161   : > { %v456_v57 = vpop.permute.xlu0 %455 }
 0x162   : > { %472 = vst.msk [vmem:[%s1186_s14 + $0x38] sm:$0xff] %vm432_vm1, %v456_v57 }
 0x163 PF: > { %s540_s23 = sand.u32 1, %s947_s15   ;;  %p759_p5 = pnand %p675_p11, %p1050_p6 }
 0x164   : > { %s541_s27 = scalar_lea.sflag [#allocation5], %s540_s23 }
 0x165   : > { %p760_p7 = pneg %p759_p5 }
 0x167   : > { %942 = dma.done.wait (%p760_p7), %s541_s27, 1024  }
 0x168   : > { %944 = vsyncadd (%p760_p7), %s541_s27, 4294966272  ;;  %s22_s20 = sadd.s32 1, %s967_s20   ;;  %s1258_s28 = sld [smem:[#allocation12_spill]] }
 0x169   : > { %p19_p9 = scmp.ge.s32.totalorder %s22_s20, 4   ;;  %s1259_s15 = smov %s951_s16 }
 0x16a   : > { %s1260_s16 = smov %s955_s17  ;;  %s1261_s17 = smov %s1092_s22 }
 0x16b   : > { %s1262_s18 = smov %s963_s19  ;;  %21 = sbr.rel (!%p19_p9) target bundleno = 9 (0x9), region = 110 }
 0x16e   : > { %s1263_s19 = smov %s1258_s28 }
 0x170   :  { %563 = vsyncpa [#allocation4], 1 }
 0x171   :  { %565 = vsyncpa [#allocation4 + $0x1], 1 }
 0x172   :  { %566 = vsyncpa [#allocation7], 1 }
 0x173   :  { %567 = vsyncpa [#allocation5], 1 }
 0x174   :  { %569 = vsyncpa [#allocation5 + $0x1], 1 }

</bundles_post_ra>
